<compile_context>
chip_gen: v6e
topology: v6e:2x2x1
jax: 0.10.0
libtpu: 0.0.40
codegen_flags: <defaults>
</compile_context>

<pallas_src>
import functools
import math

import jax
import jax.numpy as jnp
from jax.experimental import pallas as pl
from jax.experimental.pallas import tpu as pltpu


def _round_up(v, m):
    return ((v + m - 1) // m) * m


# --------------------------------------------------------------------------- #
# Per-chip defaults (VMEM limit, target M tile, TC count).                     #
# --------------------------------------------------------------------------- #
def _chip_profile():
    kind = ""
    try:
        kind = jax.devices()[0].device_kind.lower()
    except Exception:
        pass
    if "v7" in kind:
        # 64 MiB physical VMEM per TC, 2 TCs, ~3.2 TB/s HBM -> small slabs OK.
        return {"vmem_limit": 48 << 20, "tm_target": 384, "two_tc": True}
    if "v6" in kind:
        # 128 MiB physical, ~640 FLOP/byte roofline -> big M tiles when streaming.
        return {"vmem_limit": 100 << 20, "tm_target": 1024, "two_tc": False}
    if "v5" in kind:
        return {"vmem_limit": 96 << 20, "tm_target": 512, "two_tc": False}
    # Unknown chip: conservative.
    return {"vmem_limit": 64 << 20, "tm_target": 512, "two_tc": False}


def _pick_tm(M, target, two_tc):
    """Pick an M tile: multiple of 8, <= target, >=2 tiles on 2-TC chips, and
    preferably a divisor of M so no padding copy is needed."""
    target = max(8, _round_up(int(target), 8))
    M8 = _round_up(M, 8)
    target = min(target, M8)
    if two_tc and M8 >= 16:
        target = min(target, _round_up(M8 // 2, 8))  # guarantee >= 2 M tiles
    if M == M8:  # M already a multiple of 8 -> look for a padding-free divisor
        d = target
        while d >= 8:
            if M % d == 0:
                if 2 * d >= target:  # only accept divisors that aren't tiny
                    return d
                break
            d -= 8
    return target


def _gelu(h, approx):
    if approx:
        # tanh approximation (EUP path).  Slightly different numerics vs torch
        # nn.GELU() default.
        c = jnp.float32(math.sqrt(2.0 / math.pi))
        return 0.5 * h * (1.0 + jnp.tanh(c * (h + jnp.float32(0.044715) * h * h * h)))
    return 0.5 * h * (1.0 + jax.lax.erf(h * jnp.float32(1.0 / math.sqrt(2.0))))


# --------------------------------------------------------------------------- #
# Kernels                                                                       #
# --------------------------------------------------------------------------- #
def _mlp_kernel_resident(x_ref, w1_ref, b1_ref, w2_ref, b2_ref, o_ref, *, approx_gelu):
    # Whole hidden dim in one shot; weights VMEM-resident across M tiles.
    h = jnp.dot(x_ref[...], w1_ref[...], preferred_element_type=jnp.float32)
    h = h + b1_ref[...]
    h = _gelu(h, approx_gelu)
    out = jnp.dot(h.astype(w2_ref.dtype), w2_ref[...],
                  preferred_element_type=jnp.float32)
    o_ref[...] = (out + b2_ref[...]).astype(o_ref.dtype)


def _mlp_kernel_stream(x_ref, w1_ref, b1_ref, w2_ref, b2_ref, o_ref, acc_ref,
                       *, approx_gelu):
    # x_ref : (tm, E)   w1_ref: (E, th)   b1_ref: (1, th)
    # w2_ref: (th, E)   b2_ref: (1, E)    o_ref : (tm, E)
    # acc_ref: (tm, E) f32 accumulator over the H (reduction) axis.
    h_idx = pl.program_id(1)

    @pl.when(h_idx == 0)
    def _():
        acc_ref[...] = jnp.zeros_like(acc_ref)

    h = jnp.dot(x_ref[...], w1_ref[...], preferred_element_type=jnp.float32)
    h = h + b1_ref[...]
    h = _gelu(h, approx_gelu)

    acc_ref[...] += jnp.dot(h.astype(w2_ref.dtype), w2_ref[...],
                            preferred_element_type=jnp.float32)

    @pl.when(h_idx == pl.num_programs(1) - 1)
    def _():
        o_ref[...] = (acc_ref[...] + b2_ref[...]).astype(o_ref.dtype)


# --------------------------------------------------------------------------- #
# Wrapper                                                                       #
# --------------------------------------------------------------------------- #
@functools.partial(
    jax.jit,
    static_argnames=("tm", "th", "compute_dtype", "approx_gelu", "weights_resident"))
def mlp_pallas(x, w1, b1, w2, b2, *, tm=None, th=None,
               compute_dtype=jnp.bfloat16, approx_gelu=False,
               weights_resident=None):
    """x: (B, T, E). Returns (B, T, E) in x.dtype.

    compute_dtype: MXU operand dtype (default bf16; accumulation/bias/GELU f32).
        Pre-cast weights with prepare_mlp_params() to avoid per-call casts.
    tm / th: override M / hidden tile (auto per chip generation if None).
    weights_resident: force (True/False) or auto-detect (None) whether both
        weight matrices stay VMEM-resident across M tiles.
    approx_gelu: use tanh GELU (EUP) instead of exact erf.
    """
    B, T, E = x.shape
    H = w1.shape[1]  # 4 * E
    M = B * T
    out_dtype = x.dtype

    prof = _chip_profile()
    vmem_limit = prof["vmem_limit"]

    cd = compute_dtype if compute_dtype is not None else x.dtype
    cdsize = jnp.dtype(cd).itemsize
    out_size = jnp.dtype(out_dtype).itemsize

    # --- dtype handling (no-op converts if params were pre-cast) -------------
    x = x.astype(cd)
    w1c = w1.astype(cd)
    w2c = w2.astype(cd)
    b1_2d = b1.reshape(1, H).astype(jnp.float32)
    b2_2d = b2.reshape(1, E).astype(jnp.float32)

    # --- M tile ---------------------------------------------------------------
    tm_target = prof["tm_target"] if tm is None else int(tm)
    tm = _pick_tm(M, tm_target, prof["two_tc"])
    M_pad = _round_up(M, tm)

    # --- resident vs streaming decision ---------------------------------------
    def _resident_bytes(tm_):
        weights = 2 * E * H * cdsize * 2          # conservative: double-buffered
        x_tiles = 2 * tm_ * E * cdsize
        o_tiles = 2 * tm_ * E * out_size
        biases = (H + E) * 4 * 2
        return weights + x_tiles + o_tiles + biases

    if weights_resident is None:
        weights_resident = _resident_bytes(tm) <= int(0.8 * vmem_limit)

    x2d = x.reshape(M, E)
    if M_pad != M:
        x2d = jnp.pad(x2d, ((0, M_pad - M), (0, 0)))

    if weights_resident:
        # ----- fast path: th == H, weights DMA'd once, no accumulator ---------
        out2d = pl.pallas_call(
            functools.partial(_mlp_kernel_resident, approx_gelu=approx_gelu),
            out_shape=jax.ShapeDtypeStruct((M_pad, E), out_dtype),
            grid_spec=pltpu.PrefetchScalarGridSpec(
                num_scalar_prefetch=0,
                grid=(M_pad // tm,),
                in_specs=[
                    pl.BlockSpec((tm, E), lambda i: (i, 0)),   # x tile (streams)
                    pl.BlockSpec((E, H), lambda i: (0, 0)),    # W1 (resident)
                    pl.BlockSpec((1, H), lambda i: (0, 0)),    # b1 (resident)
                    pl.BlockSpec((H, E), lambda i: (0, 0)),    # W2 (resident)
                    pl.BlockSpec((1, E), lambda i: (0, 0)),    # b2 (resident)
                ],
                out_specs=pl.BlockSpec((tm, E), lambda i: (i, 0)),
            ),
            compiler_params=pltpu.CompilerParams(
                dimension_semantics=("parallel",),
                vmem_limit_bytes=vmem_limit,
            ),
        )(x2d, w1c, b1_2d, w2c, b2_2d)
    else:
        # ----- streaming path: (M, H) grid, H is the reduction axis -----------
        if th is None:
            th = H
            for cand in (512, 256, 128):
                if H % cand == 0:
                    th = cand
                    break
        th = int(th)
        assert H % th == 0, "hidden tile must divide H"

        def _stream_bytes(tm_, th_):
            return (2 * (tm_ * E + E * th_ + th_ * E) * cdsize
                    + 2 * tm_ * E * out_size + tm_ * E * 4 + (H + E) * 8)

        # Shrink the streamed hidden slab (then tm) if the slabs would exceed the
        # per-chip VMEM budget (important on v7x's 64 MiB).
        while (_stream_bytes(tm, th) > int(0.8 * vmem_limit)
               and th > 128 and H % (th // 2) == 0):
            th //= 2
        guard = 0
        while _stream_bytes(tm, th) > int(0.8 * vmem_limit) and tm > 8 and guard < 16:
            tm = max(8, _round_up(tm // 2, 8))
            guard += 1
        M_pad = _round_up(M, tm)
        if x2d.shape[0] != M_pad:
            x2d = x.reshape(M, E)
            if M_pad != M:
                x2d = jnp.pad(x2d, ((0, M_pad - M), (0, 0)))

        grid = (M_pad // tm, H // th)
        out2d = pl.pallas_call(
            functools.partial(_mlp_kernel_stream, approx_gelu=approx_gelu),
            out_shape=jax.ShapeDtypeStruct((M_pad, E), out_dtype),
            grid_spec=pltpu.PrefetchScalarGridSpec(
                num_scalar_prefetch=0,
                grid=grid,
                in_specs=[
                    pl.BlockSpec((tm, E), lambda i, j: (i, 0)),   # x tile
                    pl.BlockSpec((E, th), lambda i, j: (0, j)),   # W1 column slice
                    pl.BlockSpec((1, th), lambda i, j: (0, j)),   # b1 slice
                    pl.BlockSpec((th, E), lambda i, j: (j, 0)),   # W2 row slice
                    pl.BlockSpec((1, E), lambda i, j: (0, 0)),    # b2 (constant)
                ],
                out_specs=pl.BlockSpec((tm, E), lambda i, j: (i, 0)),
                scratch_shapes=[pltpu.VMEM((tm, E), jnp.float32)],
            ),
            compiler_params=pltpu.CompilerParams(
                dimension_semantics=("parallel", "arbitrary"),
                vmem_limit_bytes=vmem_limit,
            ),
        )(x2d, w1c, b1_2d, w2c, b2_2d)

    if M_pad != M:
        out2d = out2d[:M]
    return out2d.reshape(B, T, E)


# --------------------------------------------------------------------------- #
# Parameter helpers                                                             #
# --------------------------------------------------------------------------- #
def init_mlp_params(key, embd_dim, dtype=jnp.float32):
    """Deterministic init mimicking nn.Linear default (uniform +-1/sqrt(fan_in)).
    Weights are returned as (in_features, out_features)."""
    hidden = 4 * embd_dim
    k1, k2, k3, k4 = jax.random.split(key, 4)
    bound1 = 1.0 / math.sqrt(embd_dim)
    bound2 = 1.0 / math.sqrt(hidden)
    w1 = jax.random.uniform(k1, (embd_dim, hidden), dtype, -bound1, bound1)
    b1 = jax.random.uniform(k2, (hidden,), dtype, -bound1, bound1)
    w2 = jax.random.uniform(k3, (hidden, embd_dim), dtype, -bound2, bound2)
    b2 = jax.random.uniform(k4, (embd_dim,), dtype, -bound2, bound2)
    return w1, b1, w2, b2


def prepare_mlp_params(w1, b1, w2, b2, compute_dtype=jnp.bfloat16):
    """One-time (outside-jit) cast of weights to the MXU operand dtype and
    biases to f32, so the jitted forward does no per-call HBM weight recast."""
    return (w1.astype(compute_dtype), b1.astype(jnp.float32),
            w2.astype(compute_dtype), b2.astype(jnp.float32))


def mlp_reference(x, w1, b1, w2, b2):
    h = x @ w1 + b1
    h = 0.5 * h * (1.0 + jax.lax.erf(h / jnp.sqrt(jnp.float32(2.0))))
    return h @ w2 + b2


if __name__ == "__main__":
    key = jax.random.PRNGKey(0)
    kx1, kp1, kx2, kp2, kx3 = jax.random.split(key, 5)

    # --- Test 1: toy config (batch=2, seq=8, embd_dim=32). -------------------
    B, T, E = 2, 8, 32
    x = jax.random.normal(kx1, (B, T, E), jnp.float32)
    w1, b1, w2, b2 = init_mlp_params(kp1, E)
    ref = mlp_reference(x, w1, b1, w2, b2)

    # Default path: bf16 MXU operands (pre-cast once), weights-resident kernel.
    prep = prepare_mlp_params(w1, b1, w2, b2, jnp.bfloat16)
    out_bf16 = jax.block_until_ready(mlp_pallas(x, *prep))
    assert out_bf16.shape == (B, T, E)
    assert jnp.allclose(out_bf16, ref, atol=5e-2, rtol=5e-2), "bf16 default mismatch"

    # Exact f32 path for tight numerical check.
    out_f32 = jax.block_until_ready(
        mlp_pallas(x, w1, b1, w2, b2, compute_dtype=jnp.float32))
    assert jnp.allclose(out_f32, ref, atol=1e-5, rtol=1e-5), "f32 mismatch"

    # --- Test 2: ragged M (=24) + forced streaming path (multi-step H). ------
    B2, T2, E2 = 2, 12, 64          # M=24 (divisor tm, no padding), H=256
    x2 = jax.random.normal(kx2, (B2, T2, E2), jnp.float32)
    p2 = init_mlp_params(kp2, E2)
    ref2 = mlp_reference(x2, *p2)

    out2 = jax.block_until_ready(
        mlp_pallas(x2, *p2, compute_dtype=jnp.float32,
                   weights_resident=False, th=128))
    assert out2.shape == (B2, T2, E2)
    assert jnp.allclose(out2, ref2, atol=1e-5, rtol=1e-5), "streamed f32 mismatch"

    prep2 = prepare_mlp_params(*p2, compute_dtype=jnp.bfloat16)
    out2b = jax.block_until_ready(
        mlp_pallas(x2, *prep2, weights_resident=False, th=128))
    assert jnp.allclose(out2b, ref2, atol=1e-1, rtol=1e-1), "streamed bf16 mismatch"

    # --- Test 3: M not a multiple of 8 (padding fallback), resident path. ----
    B3, T3 = 2, 7                   # M=14 -> padded to 16
    x3 = jax.random.normal(kx3, (B3, T3, E2), jnp.float32)
    ref3 = mlp_reference(x3, *p2)
    out3 = jax.block_until_ready(
        mlp_pallas(x3, *p2, compute_dtype=jnp.float32))
    assert out3.shape == (B3, T3, E2)
    assert jnp.allclose(out3, ref3, atol=1e-5, rtol=1e-5), "padded f32 mismatch"

    print("KERNEL_OK")
</pallas_src>

<mosaic_0001>
module attributes {stable_mosaic.version = 11 : i64} {
  func.func @_mlp_kernel_resident(%arg0: i32, %arg1: memref<16x32xbf16, #tpu.memory_space<vmem>>, %arg2: memref<32x128xbf16, #tpu.memory_space<vmem>>, %arg3: memref<1x128xf32, #tpu.memory_space<vmem>>, %arg4: memref<128x32xbf16, #tpu.memory_space<vmem>>, %arg5: memref<1x32xf32, #tpu.memory_space<vmem>>, %arg6: memref<16x32xf32, #tpu.memory_space<vmem>>) attributes {dimension_semantics = [#tpu.dimension_semantics<parallel>], iteration_bounds = array<i64: 1>, scalar_prefetch = 0 : i64, scratch_operands = 0 : i64, tpu.core_type = #tpu.core_type<tc>, window_params = [{transform_indices = @transform_0, window_bounds = array<i64: 16, 32>}, {pipeline_mode = #tpu.pipeline_mode<synchronous>, transform_indices = @transform_1, window_bounds = array<i64: 32, 128>}, {pipeline_mode = #tpu.pipeline_mode<synchronous>, transform_indices = @transform_2, window_bounds = array<i64: 1, 128>}, {pipeline_mode = #tpu.pipeline_mode<synchronous>, transform_indices = @transform_3, window_bounds = array<i64: 128, 32>}, {pipeline_mode = #tpu.pipeline_mode<synchronous>, transform_indices = @transform_4, window_bounds = array<i64: 1, 32>}, {transform_indices = @transform_5, window_bounds = array<i64: 16, 32>}]} {
    %c0 = arith.constant 0 : index
    %c0_0 = arith.constant 0 : index
    %0 = vector.load %arg1[%c0, %c0_0] : memref<16x32xbf16, #tpu.memory_space<vmem>>, vector<16x32xbf16>
    %c0_1 = arith.constant 0 : index
    %c0_2 = arith.constant 0 : index
    %1 = vector.load %arg2[%c0_1, %c0_2] : memref<32x128xbf16, #tpu.memory_space<vmem>>, vector<32x128xbf16>
    %cst = arith.constant dense<0.000000e+00> : vector<16x128xf32>
    %2 = tpu.matmul %0, %1, %cst {dimension_numbers = #tpu.dot_dimension_numbers<[1], [0], [0], [1], [0, 0, 1, 1], [], []>} : vector<16x32xbf16>, vector<32x128xbf16>, vector<16x128xf32> -> vector<16x128xf32>
    %c0_3 = arith.constant 0 : index
    %c0_4 = arith.constant 0 : index
    %3 = vector.load %arg3[%c0_3, %c0_4] : memref<1x128xf32, #tpu.memory_space<vmem>>, vector<1x128xf32>
    %4 = vector.broadcast %3 : vector<1x128xf32> to vector<16x128xf32>
    %5 = arith.addf %2, %4 : vector<16x128xf32>
    %cst_5 = arith.constant 5.000000e-01 : f32
    %6 = vector.broadcast %cst_5 : f32 to vector<16x128xf32>
    %7 = arith.mulf %6, %5 : vector<16x128xf32>
    %cst_6 = arith.constant 0.707106769 : f32
    %8 = vector.broadcast %cst_6 : f32 to vector<16x128xf32>
    %9 = arith.mulf %5, %8 : vector<16x128xf32>
    %10 = math.erf %9 : vector<16x128xf32>
    %cst_7 = arith.constant 1.000000e+00 : f32
    %11 = vector.broadcast %cst_7 : f32 to vector<16x128xf32>
    %12 = arith.addf %11, %10 : vector<16x128xf32>
    %13 = arith.mulf %7, %12 : vector<16x128xf32>
    %14 = arith.truncf %13 : vector<16x128xf32> to vector<16x128xbf16>
    %c0_8 = arith.constant 0 : index
    %c0_9 = arith.constant 0 : index
    %15 = vector.load %arg4[%c0_8, %c0_9] : memref<128x32xbf16, #tpu.memory_space<vmem>>, vector<128x32xbf16>
    %cst_10 = arith.constant dense<0.000000e+00> : vector<16x32xf32>
    %16 = tpu.matmul %14, %15, %cst_10 {dimension_numbers = #tpu.dot_dimension_numbers<[1], [0], [0], [1], [0, 0, 1, 1], [], []>} : vector<16x128xbf16>, vector<128x32xbf16>, vector<16x32xf32> -> vector<16x32xf32>
    %c0_11 = arith.constant 0 : index
    %c0_12 = arith.constant 0 : index
    %17 = vector.load %arg5[%c0_11, %c0_12] : memref<1x32xf32, #tpu.memory_space<vmem>>, vector<1x32xf32>
    %18 = vector.broadcast %17 : vector<1x32xf32> to vector<16x32xf32>
    %19 = arith.addf %16, %18 : vector<16x32xf32>
    %c0_13 = arith.constant 0 : index
    %c0_14 = arith.constant 0 : index
    %20 = vector.load %arg6[%c0_13, %c0_14] : memref<16x32xf32, #tpu.memory_space<vmem>>, vector<16x32xf32>
    tpu.vector_store %arg6[%c0_13, %c0_14], %19 {strides = array<i32>} : memref<16x32xf32, #tpu.memory_space<vmem>>, vector<16x32xf32>,
    return
  }
  func.func @transform_0(%arg0: i32) -> (i32, i32) {
    %c0_i32 = arith.constant 0 : i32
    %c0_i32_0 = arith.constant 0 : i32
    return %arg0, %c0_i32 : i32, i32
  }
  func.func @transform_1(%arg0: i32) -> (i32, i32) {
    %c0_i32 = arith.constant 0 : i32
    %c0_i32_0 = arith.constant 0 : i32
    %c0_i32_1 = arith.constant 0 : i32
    return %c0_i32, %c0_i32_0 : i32, i32
  }
  func.func @transform_2(%arg0: i32) -> (i32, i32) {
    %c0_i32 = arith.constant 0 : i32
    %c0_i32_0 = arith.constant 0 : i32
    %c0_i32_1 = arith.constant 0 : i32
    return %c0_i32, %c0_i32_0 : i32, i32
  }
  func.func @transform_3(%arg0: i32) -> (i32, i32) {
    %c0_i32 = arith.constant 0 : i32
    %c0_i32_0 = arith.constant 0 : i32
    %c0_i32_1 = arith.constant 0 : i32
    return %c0_i32, %c0_i32_0 : i32, i32
  }
  func.func @transform_4(%arg0: i32) -> (i32, i32) {
    %c0_i32 = arith.constant 0 : i32
    %c0_i32_0 = arith.constant 0 : i32
    %c0_i32_1 = arith.constant 0 : i32
    return %c0_i32, %c0_i32_0 : i32, i32
  }
  func.func @transform_5(%arg0: i32) -> (i32, i32) {
    %c0_i32 = arith.constant 0 : i32
    %c0_i32_0 = arith.constant 0 : i32
    return %arg0, %c0_i32 : i32, i32
  }
}

</mosaic_0001>

<bundles_post_ra>
// kernel: mlp_pallas.1
= control target key start
LH: loop header
LB: loop body
LE: loop exit
PB: predicated region body
PF: predicated region fallthrough
CT: control target
= control target key end

     0   :  { %v334_v1 = vmov 0.0   ;;  %vm335_vm0 = vmmov 0   ;;  %vm52_vm1 = vcmask 261120   ;;  %s414_s0 = inlined_call_operand.vmem [shape: bf16[16,32], index: 0, kind: input, shape index: {}]   ;;  %s415_s1 = inlined_call_operand.vmem [shape: bf16[32,128], index: 1, kind: input, shape index: {}]   ;;  %s416_s2 = inlined_call_operand.vmem [shape: f32[1,128], index: 2, kind: input, shape index: {}]   ;;  %s417_s3 = inlined_call_operand.vmem [shape: bf16[128,32], index: 3, kind: input, shape index: {}]   ;;  %s418_s4 = inlined_call_operand.vmem [shape: f32[1,32], index: 4, kind: input, shape index: {}]   ;;  %s419_s5 = inlined_call_operand.hbm [shape: f32[16,32], index: 5, kind: output, shape index: {}]  }
   0x1   :  { %v297_v0 = vld [vmem:[%s415_s1 + $0x8] sm:$0xff]   ;;  %264 = vmatprep.subr.bf16.mxu0 %v334_v1  ;;  %272 = vmatprep.subr.bf16.mxu1 %v334_v1  ;;  %v298_v2 = vld [vmem:[%s415_s1] sm:$0xff]   ;;  %v300_v3 = vld [vmem:[%s417_s3 + $0x38] sm:$0xff]  }
   0x2   :  { %265 = vmatpush3.bf16.msra.mxu0 %v297_v0  ;;  %268 = vmatprep.mubr.msk.bf16.mxu0 %vm335_vm0, %v334_v1  ;;  %v299_v4 = vld [vmem:[%s414_s0] sm:$0xff]  }
   0x3   :  { %266 = vmatprep.subr.bf16.mxu0 %v334_v1  ;;  %288 = vmatprep.mubr.msk.bf16.mxu1 %vm335_vm0, %v334_v1 }
   0x4   :  { %273 = vmatpush3.bf16.msra.mxu1 %v300_v3 }
   0x5   :  { %274 = vmatprep.subr.bf16.mxu1 %v334_v1 }
   0x6   :  { %267 = vmatpush3.bf16.msra.mxu0 %v298_v2 }
   0x9   :  { %269 = vmatmul.mubr.msk.bf16.vlgmr.msra.gmra.mxu0 %vm52_vm1, %v299_v4 }
   0xa   :  { %10 = vsyncpa [#allocation3], 0  ;;  %v301_v5 = vld [vmem:[%s417_s3 + $0x30] sm:$0xff]   ;;  %v302_v6 = vld [vmem:[%s417_s3 + $0x28] sm:$0xff]   ;;  %s336_s15 = smov [#allocation2]  }
   0xb   :  { %275 = vmatpush3.bf16.msra.mxu1 %v301_v5  ;;  %v303_v7 = vld [vmem:[%s417_s3 + $0x20] sm:$0xff]   ;;  %v304_v8 = vld [vmem:[%s417_s3 + $0x18] sm:$0xff]   ;;  %v305_v9 = vld [vmem:[%s417_s3 + $0x10] sm:$0xff]   ;;  %s227_s16 = sshll.u32 %s336_s15, 4  ;;  %s228_s16 = int_to_ptr.vmem [resolvable:$true] %s227_s16 }
   0xc   :  { %276 = vmatprep.subr.bf16.mxu1 %v334_v1  ;;  %v306_v10 = vld [vmem:[%s417_s3 + $0x8] sm:$0xff]   ;;  %v307_v11 = vld [vmem:[%s417_s3] sm:$0xff]   ;;  %s312_s17 = scalar_lea.vmem %s228_s16, 256  ;;  %p317_p1 = scmp.lt.s32.totalorder %s228_s16, %s228_s16 }
   0xd   :  { %v238_v12 = vld [vmem:[%s416_s2] ss:$0 sm:$0xff]  ;;  %p313_p0 = scmp.ne.s32.totalorder %s228_s16, %s312_s17  ;;  %p318_p2 = scmp.lt.s32.totalorder %s312_s17, %s312_s17 }
   0xe   :  { %v243_v30 = vld [vmem:[%s418_s4] ss:$0 sm:$0xff] }
   0xf   :  { %277 = vmatpush3.bf16.msra.mxu1 %v302_v6  ;;  %p319_p3 = por %p318_p2, %p317_p1 }
  0x10   :  { %278 = vmatprep.subr.bf16.mxu1 %v334_v1 }
  0x11   :  { %p320_p4 = pnand %p319_p3, %p313_p0 }
  0x13   :  { %279 = vmatpush3.bf16.msra.mxu1 %v303_v7 }
  0x14   :  { %280 = vmatprep.subr.bf16.mxu1 %v334_v1 }
  0x17   :  { %281 = vmatpush3.bf16.msra.mxu1 %v304_v8 }
  0x18   :  { %282 = vmatprep.subr.bf16.mxu1 %v334_v1 }
  0x1b   :  { %283 = vmatpush3.bf16.msra.mxu1 %v305_v9 }
  0x1c   :  { %284 = vmatprep.subr.bf16.mxu1 %v334_v1 }
  0x1f   :  { %285 = vmatpush3.bf16.msra.mxu1 %v306_v10 }
  0x20   :  { %286 = vmatprep.subr.bf16.mxu1 %v334_v1 }
  0x23   :  { %287 = vmatpush3.bf16.msra.mxu1 %v307_v11 }
  0xc9   :  { %v90_v13 = vpop.f32.mrf.mxu0 }
  0xca   :  { %v91_v14 = vadd.f32 %v238_v12, %v90_v13 }
  0xcb   :  { %v270_v15 = vpop.f32.mrf.mxu0 }
  0xcc   :  { %v99_v16 = vmul.f32 0.70710677, %v91_v14  ;;  %v97_v24 = vmul.f32 0.5, %v91_v14 }
  0xcd   :  { %v93_v17 = vpop.f32.mrf.mxu0 }
  0xce   :  { %308 = verf.f32 %v99_v16  ;;  %v94_v18 = vadd.f32 %v238_v12, %v93_v17 }
  0xcf   :  { %v271_v19 = vpop.f32.mrf.mxu0 }
  0xd0   :  { %v100_v20 = vmul.f32 0.70710677, %v94_v18  ;;  %v98_v25 = vmul.f32 0.5, %v94_v18 }
  0xd2   :  { %310 = verf.f32 %v100_v20 }
  0xdb   :  { %v309_v21 = vpop.eup %308 }
  0xdc   :  { %v103_v22 = vadd.f32 1.0, %v309_v21 }
  0xde   :  { %v105_v27 = vmul.f32 %v103_v22, %v97_v24 }
  0xdf   :  { %v311_v23 = vpop.eup %310 }
  0xe0   :  { %v104_v26 = vadd.f32 1.0, %v311_v23 }
  0xe2   :  { %v106_v28 = vmul.f32 %v104_v26, %v98_v25 }
  0xe4   :  { %v107_v29 = vpack.c.bf16 %v106_v28, %v105_v27 }
  0xe6   :  { %289 = vmatmul.mubr.bf16.vlgmr.msra.gmra.mxu1 %v107_v29 }
 0x1a6   :  { %v213_v31 = vpop.f32.mrf.mxu1 }
 0x1a7   :  { %v214_v32 = vadd.f32 %v243_v30, %v213_v31 }
 0x1a8   :  { %v290_v33 = vpop.f32.mrf.mxu1 }
 0x1a9   :  { %220 = vst.msk [vmem:[#allocation2] sm:$0xff] %vm52_vm1, %v214_v32 }
 0x1aa   :  { %v216_v34 = vpop.f32.mrf.mxu1 }
 0x1ab   :  { %v217_v35 = vadd.f32 %v243_v30, %v216_v34 }
 0x1ac   :  { %v291_v36 = vpop.f32.mrf.mxu1 }
 0x1ad   :  { %221 = vst.msk [vmem:[#allocation2 + $0x8] sm:$0xff] %vm52_vm1, %v217_v35 }
 0x1ae   :  { %323 = shalt.err (!%p320_p4)
}
 0x1af   :  { %s337_s4 = smov 128   ;;  %s338_s18 = smov 8  }
 0x1b0   :  { %233 = dma.vmem_to_hbm [thread:$0]  %s228_s16, 256, %s419_s5, [#allocation3], %s337_s4, %s337_s4, %s338_s18  }
 0x1b1   :  { %332 = dma.done.wait [#allocation3], 256  }
 0x1b2   :  { %333 = vsyncadd [#allocation3], 4294967040 }
 0x1b3   :  { %237 = vsyncpa [#allocation3], 1 }

</bundles_post_ra>
